<compile_context>
chip_gen: v7x
topology: tpu7x:2x2x1
jax: 0.10.0
libtpu: 0.0.40
codegen_flags: <defaults>
</compile_context>

<pallas_src>
import functools

import jax
import jax.numpy as jnp
from jax.experimental import pallas as pl
from jax.experimental.pallas import tpu as pltpu


def _mlp_kernel(x_ref, w1_ref, b1_ref, w3_ref, b3_ref, w2_ref, b2_ref, o_ref):
    # fc1 + ReLU  (bf16 MXU operands, f32 accumulate, f32 epilogue on VPU)
    x = x_ref[...].astype(jnp.bfloat16)
    h1 = jnp.dot(x, w1_ref[...], preferred_element_type=jnp.float32)
    h1 = jnp.maximum(h1 + b1_ref[...], 0.0)
    # (dropout = identity in eval mode)
    # fc3 + ReLU
    h2 = jnp.dot(h1.astype(jnp.bfloat16), w3_ref[...],
                 preferred_element_type=jnp.float32)
    h2 = jnp.maximum(h2 + b3_ref[...], 0.0)
    # (dropout = identity in eval mode)
    # fc2 (logits, no activation); tiny class dim stored unpadded.
    out = jnp.dot(h2.astype(jnp.bfloat16), w2_ref[...],
                  preferred_element_type=jnp.float32)
    o_ref[...] = (out + b2_ref[...]).astype(o_ref.dtype)


def prepare_params(params):
    """One-time param prep (NOT on the per-call path):
    - transpose PyTorch (out, in) weights to (in, out)
    - cast weights to bf16 for the MXU (biases stay f32 for the f32 epilogue)."""
    return {
        "w1": params["fc1_w"].T.astype(jnp.bfloat16),      # (F,  H1)
        "b1": params["fc1_b"][None, :].astype(jnp.float32),  # (1,  H1)
        "w3": params["fc3_w"].T.astype(jnp.bfloat16),      # (H1, H2)
        "b3": params["fc3_b"][None, :].astype(jnp.float32),  # (1,  H2)
        "w2": params["fc2_w"].T.astype(jnp.bfloat16),      # (H2, O)
        "b2": params["fc2_b"][None, :].astype(jnp.float32),  # (1,  O)
    }


def _num_tensorcores():
    """2 TensorCores per chip on v7x (and v4 megacore); 1 on v5e/v6e."""
    try:
        kind = jax.devices()[0].device_kind.lower()
        if ("v7" in kind) or ("7x" in kind) or ("v4" in kind):
            return 2
    except Exception:
        pass
    return 1


def _pick_block_b(batch, num_tc):
    """Generation-aware batch tile."""
    if batch <= 16:
        return max(batch, 1)
    if num_tc <= 1:
        # Single TC (v5e/v6e): one grid step — the whole working set (x, bf16
        # weights ~0.2 MB, out) fits trivially in VMEM, so extra steps are
        # pure per-step overhead.
        bm = min(batch, 1024)
    else:
        # Two TCs (v7x): even split -> >=2 "parallel" steps, no tiny tail tile.
        bm = pl.cdiv(batch, num_tc)
    return max(16, ((bm + 15) // 16) * 16)   # multiple of 16 (bf16 sublanes)


@functools.partial(jax.jit, static_argnames=("block_b",))
def _mlp_forward_impl(x, kparams, block_b):
    B, F = x.shape
    w1, b1 = kparams["w1"], kparams["b1"]
    w3, b3 = kparams["w3"], kparams["b3"]
    w2, b2 = kparams["w2"], kparams["b2"]
    H1, H2, O = w1.shape[1], w3.shape[1], w2.shape[1]

    bm = block_b
    grid = (pl.cdiv(B, bm),)

    # Weights/biases: same (only) block every step -> VMEM-resident,
    # single-buffered (the default second buffer would never be used).
    full = lambda i: (0, 0)
    resident = lambda shape: pl.BlockSpec(
        shape, full, pipeline_mode=pl.Buffered(1))

    flops = 2 * B * (F * H1 + H1 * H2 + H2 * O)
    bytes_accessed = (
        B * F * 4                              # x (f32)
        + (F * H1 + H1 * H2 + H2 * O) * 2      # weights (bf16)
        + (H1 + H2 + O) * 4                    # biases (f32)
        + B * O * 4                            # output (f32, unpadded)
    )

    return pl.pallas_call(
        _mlp_kernel,
        out_shape=jax.ShapeDtypeStruct((B, O), x.dtype),
        grid_spec=pl.GridSpec(
            grid=grid,
            in_specs=[
                pl.BlockSpec((bm, F), lambda i: (i, 0)),   # x batch tile
                resident((F, H1)),                         # fc1 weight (bf16)
                resident((1, H1)),                         # fc1 bias (f32)
                resident((H1, H2)),                        # fc3 weight (bf16)
                resident((1, H2)),                         # fc3 bias (f32)
                resident((H2, O)),                         # fc2 weight (bf16)
                resident((1, O)),                          # fc2 bias (f32)
            ],
            out_specs=pl.BlockSpec((bm, O), lambda i: (i, 0)),
        ),
        compiler_params=pltpu.CompilerParams(
            dimension_semantics=("parallel",),
            vmem_limit_bytes=32 * 1024 * 1024,
        ),
        cost_estimate=pl.CostEstimate(
            flops=flops, transcendentals=0, bytes_accessed=bytes_accessed),
    )(x, w1, b1, w3, b3, w2, b2)


def mlp_forward(x, kparams, block_b=None):
    """Fused MLP forward. x: (B, F) float32. kparams: output of prepare_params."""
    if block_b is None:
        block_b = _pick_block_b(x.shape[0], _num_tensorcores())
    return _mlp_forward_impl(x, kparams, block_b=block_b)


def init_params(key, input_size, hidden_size, output_size):
    """Deterministic PyTorch-style Linear init: U(-1/sqrt(fan_in), 1/sqrt(fan_in)).
    Weights kept in the native PyTorch (out, in) layout, f32."""
    dims = [(input_size, hidden_size[0]),
            (hidden_size[0], hidden_size[1]),
            (hidden_size[1], output_size)]
    names = ["fc1", "fc3", "fc2"]
    params = {}
    for name, (fan_in, fan_out) in zip(names, dims):
        key, kw, kb = jax.random.split(key, 3)
        bound = 1.0 / (fan_in ** 0.5)
        params[f"{name}_w"] = jax.random.uniform(
            kw, (fan_out, fan_in), jnp.float32, minval=-bound, maxval=bound)
        params[f"{name}_b"] = jax.random.uniform(
            kb, (fan_out,), jnp.float32, minval=-bound, maxval=bound)
    return params


def mlp_reference(x, params):
    """Pure-JAX f32 reference (inference mode: dropout = identity)."""
    h = jnp.maximum(x @ params["fc1_w"].T + params["fc1_b"], 0.0)
    h = jnp.maximum(h @ params["fc3_w"].T + params["fc3_b"], 0.0)
    return h @ params["fc2_w"].T + params["fc2_b"]


if __name__ == "__main__":
    key = jax.random.PRNGKey(0)
    input_size = 32
    hidden_size = [256, 256]   # as in the module
    output_size = 8            # number of classes

    kx, kp = jax.random.split(key)
    params = init_params(kp, input_size, hidden_size, output_size)
    kparams = prepare_params(params)   # one-time: transpose + bf16 cast

    # Main case: batch that splits evenly across TensorCores.
    batch = 64
    x = jax.random.normal(kx, (batch, input_size), jnp.float32)
    out = jax.block_until_ready(mlp_forward(x, kparams))
    ref = mlp_reference(x, params)
    assert out.shape == (batch, output_size), out.shape
    # bf16 MXU operands vs f32 reference -> loosened tolerance.
    assert jnp.allclose(out, ref, atol=3e-2, rtol=3e-2), "mismatch vs reference"

    # Tail-tile case: batch not a multiple of the tile (clipped output writes).
    x_tail = x[:37]
    out_tail = jax.block_until_ready(mlp_forward(x_tail, kparams))
    ref_tail = mlp_reference(x_tail, params)
    assert out_tail.shape == (37, output_size), out_tail.shape
    assert jnp.allclose(out_tail, ref_tail, atol=3e-2, rtol=3e-2), "tail mismatch"

    print("KERNEL_OK")
</pallas_src>

<mosaic_0001>
module attributes {stable_mosaic.version = 11 : i64} {
  func.func @_mlp_kernel(%arg0: i32, %arg1: memref<64x32xf32, #tpu.memory_space<vmem>>, %arg2: memref<32x256xbf16, #tpu.memory_space<vmem>>, %arg3: memref<1x256xf32, #tpu.memory_space<vmem>>, %arg4: memref<256x256xbf16, #tpu.memory_space<vmem>>, %arg5: memref<1x256xf32, #tpu.memory_space<vmem>>, %arg6: memref<256x8xbf16, #tpu.memory_space<vmem>>, %arg7: memref<1x8xf32, #tpu.memory_space<vmem>>, %arg8: memref<64x8xf32, #tpu.memory_space<vmem>>) attributes {dimension_semantics = [#tpu.dimension_semantics<parallel>], iteration_bounds = array<i64: 1>, scalar_prefetch = 0 : i64, scratch_operands = 0 : i64, tpu.core_type = #tpu.core_type<tc>, window_params = [{transform_indices = @transform_0, window_bounds = array<i64: 64, 32>}, {pipeline_mode = #tpu.pipeline_mode<synchronous>, transform_indices = @transform_1, window_bounds = array<i64: 32, 256>}, {pipeline_mode = #tpu.pipeline_mode<synchronous>, transform_indices = @transform_2, window_bounds = array<i64: 1, 256>}, {pipeline_mode = #tpu.pipeline_mode<synchronous>, transform_indices = @transform_3, window_bounds = array<i64: 256, 256>}, {pipeline_mode = #tpu.pipeline_mode<synchronous>, transform_indices = @transform_4, window_bounds = array<i64: 1, 256>}, {pipeline_mode = #tpu.pipeline_mode<synchronous>, transform_indices = @transform_5, window_bounds = array<i64: 256, 8>}, {pipeline_mode = #tpu.pipeline_mode<synchronous>, transform_indices = @transform_6, window_bounds = array<i64: 1, 8>}, {transform_indices = @transform_7, window_bounds = array<i64: 64, 8>}]} {
    %c0 = arith.constant 0 : index
    %c0_0 = arith.constant 0 : index
    %0 = vector.load %arg1[%c0, %c0_0] : memref<64x32xf32, #tpu.memory_space<vmem>>, vector<64x32xf32>
    %1 = arith.truncf %0 : vector<64x32xf32> to vector<64x32xbf16>
    %c0_1 = arith.constant 0 : index
    %c0_2 = arith.constant 0 : index
    %2 = vector.load %arg2[%c0_1, %c0_2] : memref<32x256xbf16, #tpu.memory_space<vmem>>, vector<32x256xbf16>
    %cst = arith.constant dense<0.000000e+00> : vector<64x256xf32>
    %3 = tpu.matmul %1, %2, %cst {dimension_numbers = #tpu.dot_dimension_numbers<[1], [0], [0], [1], [0, 0, 1, 1], [], []>} : vector<64x32xbf16>, vector<32x256xbf16>, vector<64x256xf32> -> vector<64x256xf32>
    %c0_3 = arith.constant 0 : index
    %c0_4 = arith.constant 0 : index
    %4 = vector.load %arg3[%c0_3, %c0_4] : memref<1x256xf32, #tpu.memory_space<vmem>>, vector<1x256xf32>
    %5 = vector.broadcast %4 : vector<1x256xf32> to vector<64x256xf32>
    %6 = arith.addf %3, %5 : vector<64x256xf32>
    %cst_5 = arith.constant 0.000000e+00 : f32
    %7 = vector.broadcast %cst_5 : f32 to vector<64x256xf32>
    %8 = arith.maximumf %6, %7 : vector<64x256xf32>
    %9 = arith.truncf %8 : vector<64x256xf32> to vector<64x256xbf16>
    %c0_6 = arith.constant 0 : index
    %c0_7 = arith.constant 0 : index
    %10 = vector.load %arg4[%c0_6, %c0_7] : memref<256x256xbf16, #tpu.memory_space<vmem>>, vector<256x256xbf16>
    %cst_8 = arith.constant dense<0.000000e+00> : vector<64x256xf32>
    %11 = tpu.matmul %9, %10, %cst_8 {dimension_numbers = #tpu.dot_dimension_numbers<[1], [0], [0], [1], [0, 0, 1, 1], [], []>} : vector<64x256xbf16>, vector<256x256xbf16>, vector<64x256xf32> -> vector<64x256xf32>
    %c0_9 = arith.constant 0 : index
    %c0_10 = arith.constant 0 : index
    %12 = vector.load %arg5[%c0_9, %c0_10] : memref<1x256xf32, #tpu.memory_space<vmem>>, vector<1x256xf32>
    %13 = vector.broadcast %12 : vector<1x256xf32> to vector<64x256xf32>
    %14 = arith.addf %11, %13 : vector<64x256xf32>
    %cst_11 = arith.constant 0.000000e+00 : f32
    %15 = vector.broadcast %cst_11 : f32 to vector<64x256xf32>
    %16 = arith.maximumf %14, %15 : vector<64x256xf32>
    %17 = arith.truncf %16 : vector<64x256xf32> to vector<64x256xbf16>
    %c0_12 = arith.constant 0 : index
    %c0_13 = arith.constant 0 : index
    %18 = vector.load %arg6[%c0_12, %c0_13] : memref<256x8xbf16, #tpu.memory_space<vmem>>, vector<256x8xbf16>
    %cst_14 = arith.constant dense<0.000000e+00> : vector<64x8xf32>
    %19 = tpu.matmul %17, %18, %cst_14 {dimension_numbers = #tpu.dot_dimension_numbers<[1], [0], [0], [1], [0, 0, 1, 1], [], []>} : vector<64x256xbf16>, vector<256x8xbf16>, vector<64x8xf32> -> vector<64x8xf32>
    %c0_15 = arith.constant 0 : index
    %c0_16 = arith.constant 0 : index
    %20 = vector.load %arg7[%c0_15, %c0_16] : memref<1x8xf32, #tpu.memory_space<vmem>>, vector<1x8xf32>
    %21 = vector.broadcast %20 : vector<1x8xf32> to vector<64x8xf32>
    %22 = arith.addf %19, %21 : vector<64x8xf32>
    %c0_17 = arith.constant 0 : index
    %c0_18 = arith.constant 0 : index
    %23 = vector.load %arg8[%c0_17, %c0_18] : memref<64x8xf32, #tpu.memory_space<vmem>>, vector<64x8xf32>
    tpu.vector_store %arg8[%c0_17, %c0_18], %22 {strides = array<i32>} : memref<64x8xf32, #tpu.memory_space<vmem>>, vector<64x8xf32>,
    return
  }
  func.func @transform_0(%arg0: i32) -> (i32, i32) {
    %c0_i32 = arith.constant 0 : i32
    %c0_i32_0 = arith.constant 0 : i32
    return %arg0, %c0_i32 : i32, i32
  }
  func.func @transform_1(%arg0: i32) -> (i32, i32) {
    %c0_i32 = arith.constant 0 : i32
    %c0_i32_0 = arith.constant 0 : i32
    %c0_i32_1 = arith.constant 0 : i32
    return %c0_i32, %c0_i32_0 : i32, i32
  }
  func.func @transform_2(%arg0: i32) -> (i32, i32) {
    %c0_i32 = arith.constant 0 : i32
    %c0_i32_0 = arith.constant 0 : i32
    %c0_i32_1 = arith.constant 0 : i32
    return %c0_i32, %c0_i32_0 : i32, i32
  }
  func.func @transform_3(%arg0: i32) -> (i32, i32) {
    %c0_i32 = arith.constant 0 : i32
    %c0_i32_0 = arith.constant 0 : i32
    %c0_i32_1 = arith.constant 0 : i32
    return %c0_i32, %c0_i32_0 : i32, i32
  }
  func.func @transform_4(%arg0: i32) -> (i32, i32) {
    %c0_i32 = arith.constant 0 : i32
    %c0_i32_0 = arith.constant 0 : i32
    %c0_i32_1 = arith.constant 0 : i32
    return %c0_i32, %c0_i32_0 : i32, i32
  }
  func.func @transform_5(%arg0: i32) -> (i32, i32) {
    %c0_i32 = arith.constant 0 : i32
    %c0_i32_0 = arith.constant 0 : i32
    %c0_i32_1 = arith.constant 0 : i32
    return %c0_i32, %c0_i32_0 : i32, i32
  }
  func.func @transform_6(%arg0: i32) -> (i32, i32) {
    %c0_i32 = arith.constant 0 : i32
    %c0_i32_0 = arith.constant 0 : i32
    %c0_i32_1 = arith.constant 0 : i32
    return %c0_i32, %c0_i32_0 : i32, i32
  }
  func.func @transform_7(%arg0: i32) -> (i32, i32) {
    %c0_i32 = arith.constant 0 : i32
    %c0_i32_0 = arith.constant 0 : i32
    return %arg0, %c0_i32 : i32, i32
  }
}

</mosaic_0001>

<bundles_post_ra>
// kernel: _mlp_forward_impl.1
= control target key start
LH: loop header
LB: loop body
LE: loop exit
PB: predicated region body
PF: predicated region fallthrough
CT: control target
= control target key end

     0   :  { %12 = vsyncpa [#allocation3], 0  ;;  %s909_s24 = smov [#allocation2]   ;;  %s1106_s0 = inlined_call_operand.vmem [shape: f32[64,32], index: 0, kind: input, shape index: {}]   ;;  %s1107_s1 = inlined_call_operand.vmem [shape: bf16[32,256], index: 1, kind: input, shape index: {}]   ;;  %s1108_s2 = inlined_call_operand.vmem [shape: f32[1,256], index: 2, kind: input, shape index: {}]   ;;  %s1109_s3 = inlined_call_operand.hbm [shape: bf16[256,256], index: 3, kind: input, shape index: {}]   ;;  %s1110_s4 = inlined_call_operand.vmem [shape: f32[1,256], index: 4, kind: input, shape index: {}]   ;;  %s1111_s5 = inlined_call_operand.vmem [shape: bf16[256,8], index: 5, kind: input, shape index: {}]   ;;  %s1112_s6 = inlined_call_operand.vmem [shape: f32[1,8], index: 6, kind: input, shape index: {}]   ;;  %s1113_s7 = inlined_call_operand.vmem [shape: f32[64,8], index: 7, kind: output, shape index: {}]  }
   0x1   :  { %s24_s25 = sshll.u32 %s909_s24, 4  ;;  %s885_s28 = scalar_lea.hbm %s1109_s3, 4096  ;;  %s25_s25 = int_to_ptr.vmem [resolvable:$true] %s24_s25 }
   0x2   :  { %p886_p0 = scmp.ne.s32.totalorder %s1109_s3, %s885_s28  ;;  %p889_p1 = scmp.lt.u32.totalorder %s885_s28, %s1109_s3 }
   0x4   :  { %p891_p2 = pnand %p889_p1, %p886_p0 }
   0x6   :  { %894 = shalt.err (!%p891_p2)
}
   0x7   :  { %s895_s10 = scalar_lea.vmem %s25_s25, 4096  ;;  %p900_p4 = scmp.lt.s32.totalorder %s25_s25, %s25_s25 }
   0x8   :  { %p896_p3 = scmp.ne.s32.totalorder %s25_s25, %s895_s10  ;;  %p901_p5 = scmp.lt.s32.totalorder %s895_s10, %s895_s10 }
   0xa   :  { %p902_p6 = por %p901_p5, %p900_p4 }
   0xc   :  { %p903_p7 = pnand %p902_p6, %p896_p3 }
   0xe   :  { %906 = shalt.err (!%p903_p7)
}
   0xf   :  { %s910_s11 = smov 128   ;;  %s911_s12 = smov 8  }
  0x10   :  { %30 = dma.hbm_to_vmem [thread:$0]  %s1109_s3, 4096, %s25_s25, [#allocation3], %s910_s11, %s910_s11, %s911_s12  }
  0x11   :  { %907 = dma.done.wait [#allocation3], 4096  }
  0x12   :  { %908 = vsyncadd [#allocation3], 4294963200  ;;  %v912_v0 = vmov 0   ;;  %v815_v1 = vld [vmem:[%s1107_s1 + $0x4] ss:$8 sps:$4 sm:$0xff]   ;;  %vm89_vm0 = vcmask 261120   ;;  %v59_v61 = vlaneseq }
  0x13   :  { %134 = vmatprep.mubr.bf16.mxu0 %v912_v0  ;;  %v817_v2 = vld [vmem:[%s1107_s1] ss:$8 sps:$4 sm:$0xff]   ;;  %102 = vmatprep.subr.bf16.mxu0 %v815_v1  ;;  %v818_v3 = vld [vmem:[%s1107_s1 + $0x14] ss:$8 sps:$4 sm:$0xff]   ;;  %v820_v4 = vld [vmem:[%s1107_s1 + $0x10] ss:$8 sps:$4 sm:$0xff]  }
  0x14   :  { %103 = vmatpush1.bf16.msra.mxu0 %v817_v2  ;;  %v41_v5 = vld [vmem:[%s1106_s0] sm:$0xff]  ;;  %v42_v6 = vld [vmem:[%s1106_s0 + $0x8] sm:$0xff]  ;;  %v824_v10 = vld [vmem:[#allocation2 + $0x14] ss:$8 sps:$4 sm:$0xff]   ;;  %v1041_v62 = vshrl.u32 %v59_v61, 7  ;;  %vm700_vm1 = vcmask 64512  }
  0x15   :  { %104 = vmatprep.subr.bf16.mxu0 %v818_v3  ;;  %v49_v7 = vpack.c.bf16 %v42_v6, %v41_v5  ;;  %v821_v8 = vld [vmem:[#allocation2 + $0x4] ss:$8 sps:$4 sm:$0xff]   ;;  %v823_v9 = vld [vmem:[#allocation2] ss:$8 sps:$4 sm:$0xff]   ;;  %v826_v11 = vld [vmem:[#allocation2 + $0x10] ss:$8 sps:$4 sm:$0xff]  }
  0x16   :  { %403 = vmatprep.subr.bf16.mxu1 %v821_v8  ;;  %v827_v12 = vld [vmem:[#allocation2 + $0x24] ss:$8 sps:$4 sm:$0xff]   ;;  %v43_v13 = vld [vmem:[%s1106_s0 + $0x10] sm:$0xff]  ;;  %v44_v14 = vld [vmem:[%s1106_s0 + $0x18] sm:$0xff]  ;;  %v61_v63 = vsub.s32 0, %v1041_v62  ;;  %v65_v1 = vsub.s32 1, %v1041_v62 }
  0x17   :  { %404 = vmatpush1.bf16.msra.mxu1 %v823_v9  ;;  %v829_v15 = vld [vmem:[#allocation2 + $0x20] ss:$8 sps:$4 sm:$0xff]   ;;  %v50_v16 = vpack.c.bf16 %v44_v14, %v43_v13  ;;  %v830_v17 = vld [vmem:[#allocation2 + $0x34] ss:$8 sps:$4 sm:$0xff]   ;;  %v832_v18 = vld [vmem:[#allocation2 + $0x30] ss:$8 sps:$4 sm:$0xff]  }
  0x18   :  { %105 = vmatpush1.bf16.msra.mxu0 %v820_v4  ;;  %405 = vmatprep.subr.bf16.mxu1 %v824_v10  ;;  %v833_v19 = vld [vmem:[#allocation2 + $0x44] ss:$8 sps:$4 sm:$0xff]   ;;  %v835_v22 = vld [vmem:[#allocation2 + $0x40] ss:$8 sps:$4 sm:$0xff]   ;;  %v836_v24 = vld [vmem:[#allocation2 + $0x54] ss:$8 sps:$4 sm:$0xff]  }
  0x19   :  { %v45_v20 = vld [vmem:[%s1106_s0 + $0x20] sm:$0xff]  ;;  %v46_v21 = vld [vmem:[%s1106_s0 + $0x28] sm:$0xff]  ;;  %v838_v25 = vld [vmem:[#allocation2 + $0x50] ss:$8 sps:$4 sm:$0xff]  }
  0x1a   :  { %v51_v23 = vpack.c.bf16 %v46_v21, %v45_v20  ;;  %v839_v26 = vld [vmem:[#allocation2 + $0x64] ss:$8 sps:$4 sm:$0xff]   ;;  %v47_v27 = vld [vmem:[%s1106_s0 + $0x30] sm:$0xff]  ;;  %v48_v28 = vld [vmem:[%s1106_s0 + $0x38] sm:$0xff] }
  0x1b   :  { %718 = vmatmul.mubr.msk.bf16.vlgmr.msra.gmra.mrb[0].mxu0 %vm89_vm0, %v49_v7  ;;  %406 = vmatpush1.bf16.msra.mxu1 %v826_v11  ;;  %v841_v29 = vld [vmem:[#allocation2 + $0x60] ss:$8 sps:$4 sm:$0xff]   ;;  %v842_v30 = vld [vmem:[#allocation2 + $0x74] ss:$8 sps:$4 sm:$0xff]   ;;  %v52_v31 = vpack.c.bf16 %v48_v28, %v47_v27  ;;  %v844_v32 = vld [vmem:[#allocation2 + $0x70] ss:$8 sps:$4 sm:$0xff]  }
  0x1c   :  { %144 = vmatprep.mubr.bf16.mxu0 %v912_v0  ;;  %407 = vmatprep.subr.bf16.mxu1 %v827_v12  ;;  %v845_v33 = vld [vmem:[#allocation2 + $0x84] ss:$8 sps:$4 sm:$0xff]   ;;  %v847_v34 = vld [vmem:[#allocation2 + $0x80] ss:$8 sps:$4 sm:$0xff]   ;;  %v848_v35 = vld [vmem:[#allocation2 + $0x94] ss:$8 sps:$4 sm:$0xff]  }
  0x1d   :  { %v850_v36 = vld [vmem:[#allocation2 + $0x90] ss:$8 sps:$4 sm:$0xff]   ;;  %v851_v37 = vld [vmem:[#allocation2 + $0xa4] ss:$8 sps:$4 sm:$0xff]   ;;  %v853_v38 = vld [vmem:[#allocation2 + $0xa0] ss:$8 sps:$4 sm:$0xff]  }
  0x1e   :  { %v854_v39 = vld [vmem:[#allocation2 + $0xb4] ss:$8 sps:$4 sm:$0xff]   ;;  %v856_v40 = vld [vmem:[#allocation2 + $0xb0] ss:$8 sps:$4 sm:$0xff]   ;;  %v857_v41 = vld [vmem:[#allocation2 + $0xc4] ss:$8 sps:$4 sm:$0xff]  }
  0x1f   :  { %408 = vmatpush1.bf16.msra.mxu1 %v829_v15  ;;  %v859_v42 = vld [vmem:[#allocation2 + $0xc0] ss:$8 sps:$4 sm:$0xff]   ;;  %v860_v43 = vld [vmem:[#allocation2 + $0xd4] ss:$8 sps:$4 sm:$0xff]   ;;  %v862_v44 = vld [vmem:[#allocation2 + $0xd0] ss:$8 sps:$4 sm:$0xff]  }
  0x20   :  { %409 = vmatprep.subr.bf16.mxu1 %v830_v17  ;;  %v863_v45 = vld [vmem:[#allocation2 + $0xe4] ss:$8 sps:$4 sm:$0xff]   ;;  %v865_v46 = vld [vmem:[#allocation2 + $0xe0] ss:$8 sps:$4 sm:$0xff]   ;;  %v866_v47 = vld [vmem:[#allocation2 + $0xf4] ss:$8 sps:$4 sm:$0xff]  }
  0x21   :  { %v868_v48 = vld [vmem:[#allocation2 + $0xf0] ss:$8 sps:$4 sm:$0xff]   ;;  %v869_v49 = vld [vmem:[%s1111_s5 + $0x40] sm:$0xff]   ;;  %v871_v51 = vld [vmem:[%s1111_s5 + $0x48] sm:$0xff]  }
  0x22   :  { %v870_v50 = vld [vmem:[%s1111_s5] sm:$0xff]   ;;  %771 = vmatprep.subr.bf16.mxu0 %v869_v49  ;;  %v872_v52 = vld [vmem:[%s1111_s5 + $0x8] sm:$0xff]   ;;  %v873_v53 = vld [vmem:[%s1111_s5 + $0x50] sm:$0xff]  }
  0x23   :  { %719 = vmatmul.mubr.msk.bf16.gmra.mrb[4].mxu0 %vm89_vm0, %v50_v16  ;;  %410 = vmatpush1.bf16.msra.mxu1 %v832_v18  ;;  %v874_v54 = vld [vmem:[%s1111_s5 + $0x10] sm:$0xff]   ;;  %v875_v55 = vld [vmem:[%s1111_s5 + $0x58] sm:$0xff]   ;;  %v877_v57 = vld [vmem:[%s1111_s5 + $0x60] sm:$0xff]  }
  0x24   :  { %154 = vmatprep.mubr.bf16.mxu0 %v912_v0  ;;  %411 = vmatprep.subr.bf16.mxu1 %v833_v19  ;;  %v876_v56 = vld [vmem:[%s1111_s5 + $0x18] sm:$0xff]   ;;  %v878_v58 = vld [vmem:[%s1111_s5 + $0x20] sm:$0xff]   ;;  %v879_v59 = vld [vmem:[%s1111_s5 + $0x68] sm:$0xff]  }
  0x25   :  { %772 = vmatpush3.bf16.msra.mxu0 %v870_v50  ;;  %v880_v60 = vld [vmem:[%s1111_s5 + $0x28] sm:$0xff]   ;;  %v882_v61 = vld [vmem:[%s1111_s5 + $0x30] sm:$0xff]  }
  0x26   :  { %773 = vmatprep.subr.bf16.mxu0 %v871_v51 }
  0x27   :  { %412 = vmatpush1.bf16.msra.mxu1 %v835_v22 }
  0x28   :  { %413 = vmatprep.subr.bf16.mxu1 %v836_v24 }
  0x29   :  { %774 = vmatpush3.bf16.msra.mxu0 %v872_v52 }
  0x2a   :  { %775 = vmatprep.subr.bf16.mxu0 %v873_v53 }
  0x2b   :  { %720 = vmatmul.mubr.msk.bf16.gmra.mrb[8].mxu0 %vm89_vm0, %v51_v23  ;;  %414 = vmatpush1.bf16.msra.mxu1 %v838_v25 }
  0x2c   :  { %164 = vmatprep.mubr.bf16.mxu0 %v912_v0  ;;  %415 = vmatprep.subr.bf16.mxu1 %v839_v26  ;;  %v57_v0 = vld [vmem:[%s1108_s2] sm:$0x3] }
  0x2d   :  { %776 = vmatpush3.bf16.msra.mxu0 %v874_v54  ;;  %v62_v2 = vrot.slane %v57_v0, %v61_v63  ;;  %v66_v3 = vrot.slane %v57_v0, %v65_v1  ;;  %v883_v0 = vld [vmem:[%s1111_s5 + $0x78] sm:$0xff]  }
  0x2e   :  { %777 = vmatprep.subr.bf16.mxu0 %v875_v55 }
  0x2f   :  { %416 = vmatpush1.bf16.msra.mxu1 %v841_v29 }
  0x30   :  { %417 = vmatprep.subr.bf16.mxu1 %v842_v30 }
  0x31   :  { %778 = vmatpush3.bf16.msra.mxu0 %v876_v56 }
  0x32   :  { %779 = vmatprep.subr.bf16.mxu0 %v877_v57 }
  0x33   :  { %721 = vmatmul.mubr.msk.bf16.gmra.mrb[12].mxu0 %vm89_vm0, %v52_v31  ;;  %418 = vmatpush1.bf16.msra.mxu1 %v844_v32 }
  0x34   :  { %419 = vmatprep.subr.bf16.mxu1 %v845_v33 }
  0x35   :  { %780 = vmatpush3.bf16.msra.mxu0 %v878_v58 }
  0x36   :  { %781 = vmatprep.subr.bf16.mxu0 %v879_v59 }
  0x37   :  { %420 = vmatpush1.bf16.msra.mxu1 %v847_v34 }
  0x38   :  { %421 = vmatprep.subr.bf16.mxu1 %v848_v35 }
  0x39   :  { %782 = vmatpush3.bf16.msra.mxu0 %v880_v60  ;;  %v881_v60 = vld [vmem:[%s1111_s5 + $0x70] sm:$0xff]  }
  0x3a   :  { %783 = vmatprep.subr.bf16.mxu0 %v881_v60  ;;  %v754_v60 = vld [vmem:[%s1112_s6] ss:$0 sm:$0xff] }
  0x3b   :  { %422 = vmatpush1.bf16.msra.mxu1 %v850_v36 }
  0x3c   :  { %423 = vmatprep.subr.bf16.mxu1 %v851_v37 }
  0x3d   :  { %784 = vmatpush3.bf16.msra.mxu0 %v882_v61 }
  0x3e   :  { %785 = vmatprep.subr.bf16.mxu0 %v883_v0 }
  0x3f   :  { %424 = vmatpush1.bf16.msra.mxu1 %v853_v38 }
  0x40   :  { %425 = vmatprep.subr.bf16.mxu1 %v854_v39 }
  0x43   :  { %426 = vmatpush1.bf16.msra.mxu1 %v856_v40 }
  0x44   :  { %427 = vmatprep.subr.bf16.mxu1 %v857_v41 }
  0x47   :  { %428 = vmatpush1.bf16.msra.mxu1 %v859_v42 }
  0x48   :  { %429 = vmatprep.subr.bf16.mxu1 %v860_v43 }
  0x4b   :  { %430 = vmatpush1.bf16.msra.mxu1 %v862_v44 }
  0x4c   :  { %431 = vmatprep.subr.bf16.mxu1 %v863_v45 }
  0x4f   :  { %432 = vmatpush1.bf16.msra.mxu1 %v865_v46 }
  0x50   :  { %433 = vmatprep.subr.bf16.mxu1 %v866_v47 }
  0x53   :  { %434 = vmatpush1.bf16.msra.mxu1 %v868_v48 }
  0xee   :  { %v136_v4 = vpop.f32.mrb[0].mxu0 }
  0xef   :  { %v137_v5 = vadd.f32 %v136_v4, %v62_v2  ;;  %v138_v6 = vpop.f32.mrb[1].mxu0 }
  0xf0   :  { %v139_v7 = vadd.f32 %v138_v6, %v66_v3  ;;  %v140_v8 = vpop.f32.mrb[2].mxu0 }
  0xf1   :  { %v141_v9 = vadd.f32 %v140_v8, %v62_v2  ;;  %v142_v10 = vpop.f32.mrb[3].mxu0  ;;  %v175_v12 = vmax.f32 %v137_v5, 0.0 }
  0xf2   :  { %v143_v11 = vadd.f32 %v142_v10, %v66_v3  ;;  %v176_v14 = vmax.f32 %v139_v7, 0.0 }
  0xf3   :  { %v177_v13 = vmax.f32 %v141_v9, 0.0 }
  0xf4   :  { %v178_v15 = vmax.f32 %v143_v11, 0.0 }
  0xf5   :  { %v191_v16 = vpack.c.bf16 %v177_v13, %v175_v12 }
  0xf6   :  { %v146_v17 = vpop.f32.mrb[4].mxu0  ;;  %v192_v18 = vpack.c.bf16 %v178_v15, %v176_v14 }
  0xf7   :  { %v147_v19 = vadd.f32 %v146_v17, %v62_v2  ;;  %v148_v20 = vpop.f32.mrb[5].mxu0 }
  0xf8   :  { %v149_v21 = vadd.f32 %v148_v20, %v66_v3  ;;  %v150_v22 = vpop.f32.mrb[6].mxu0  ;;  %435 = vmatprep.mubr.bf16.mxu1 %v192_v18 }
  0xf9   :  { %v151_v23 = vadd.f32 %v150_v22, %v62_v2  ;;  %v152_v24 = vpop.f32.mrb[7].mxu0  ;;  %436 = vmatmul.mubr.bf16.vlgmr.msra.gmra.mrb[0].mxu1 %v191_v16  ;;  %v179_v26 = vmax.f32 %v147_v19, 0.0 }
  0xfa   :  { %v153_v25 = vadd.f32 %v152_v24, %v66_v3  ;;  %v180_v28 = vmax.f32 %v149_v21, 0.0 }
  0xfb   :  { %v181_v27 = vmax.f32 %v151_v23, 0.0 }
  0xfc   :  { %v182_v29 = vmax.f32 %v153_v25, 0.0 }
  0xfd   :  { %v193_v30 = vpack.c.bf16 %v181_v27, %v179_v26 }
  0xfe   :  { %v194_v31 = vpack.c.bf16 %v182_v29, %v180_v28  ;;  %v156_v32 = vpop.f32.mrb[8].mxu0 }
  0xff   :  { %v157_v33 = vadd.f32 %v156_v32, %v62_v2  ;;  %v158_v34 = vpop.f32.mrb[9].mxu0 }
 0x100   :  { %v159_v35 = vadd.f32 %v158_v34, %v66_v3  ;;  %v160_v36 = vpop.f32.mrb[10].mxu0  ;;  %445 = vmatprep.mubr.bf16.mxu1 %v194_v31 }
 0x101   :  { %v161_v37 = vadd.f32 %v160_v36, %v62_v2  ;;  %v162_v38 = vpop.f32.mrb[11].mxu0  ;;  %446 = vmatmul.mubr.bf16.gmra.mrb[4].mxu1 %v193_v30  ;;  %v183_v40 = vmax.f32 %v157_v33, 0.0 }
 0x102   :  { %v163_v39 = vadd.f32 %v162_v38, %v66_v3  ;;  %v184_v42 = vmax.f32 %v159_v35, 0.0 }
 0x103   :  { %v185_v41 = vmax.f32 %v161_v37, 0.0 }
 0x104   :  { %v186_v43 = vmax.f32 %v163_v39, 0.0 }
 0x105   :  { %v195_v44 = vpack.c.bf16 %v185_v41, %v183_v40 }
 0x106   :  { %v196_v45 = vpack.c.bf16 %v186_v43, %v184_v42  ;;  %v166_v46 = vpop.f32.mrb[12].mxu0 }
 0x107   :  { %v167_v47 = vadd.f32 %v166_v46, %v62_v2  ;;  %v168_v48 = vpop.f32.mrb[13].mxu0 }
 0x108   :  { %v169_v49 = vadd.f32 %v168_v48, %v66_v3  ;;  %v170_v50 = vpop.f32.mrb[14].mxu0  ;;  %455 = vmatprep.mubr.bf16.mxu1 %v196_v45 }
 0x109   :  { %v171_v51 = vadd.f32 %v170_v50, %v62_v2  ;;  %v172_v52 = vpop.f32.mrb[15].mxu0  ;;  %456 = vmatmul.mubr.bf16.gmra.mrb[8].mxu1 %v195_v44  ;;  %v187_v54 = vmax.f32 %v167_v47, 0.0  ;;  %v884_v2 = vld [vmem:[%s1111_s5 + $0x38] sm:$0xff]  }
 0x10a   :  { %v173_v53 = vadd.f32 %v172_v52, %v66_v3  ;;  %v188_v56 = vmax.f32 %v169_v49, 0.0  ;;  %786 = vmatpush3.bf16.msra.mxu0 %v884_v2  ;;  %v231_v3 = vld [vmem:[%s1110_s4] sm:$0x3] }
 0x10b   :  { %v189_v55 = vmax.f32 %v171_v51, 0.0  ;;  %v236_v4 = vrot.slane %v231_v3, %v61_v63  ;;  %v240_v5 = vrot.slane %v231_v3, %v65_v1 }
 0x10c   :  { %v190_v57 = vmax.f32 %v173_v53, 0.0 }
 0x10d   :  { %v197_v58 = vpack.c.bf16 %v189_v55, %v187_v54 }
 0x10e   :  { %v198_v59 = vpack.c.bf16 %v190_v57, %v188_v56 }
 0x110   :  { %465 = vmatprep.mubr.bf16.mxu1 %v198_v59 }
 0x111   :  { %466 = vmatmul.mubr.bf16.gmra.mrb[12].mxu1 %v197_v58 }
 0x1cc   :  { %v437_v6 = vpop.f32.mrb[0].mxu1 }
 0x1cd   :  { %v438_v7 = vadd.f32 %v437_v6, %v236_v4  ;;  %v439_v8 = vpop.f32.mrb[1].mxu1 }
 0x1ce   :  { %v440_v9 = vadd.f32 %v439_v8, %v240_v5  ;;  %v441_v10 = vpop.f32.mrb[2].mxu1 }
 0x1cf   :  { %v442_v11 = vadd.f32 %v441_v10, %v236_v4  ;;  %v443_v12 = vpop.f32.mrb[3].mxu1  ;;  %v476_v14 = vmax.f32 %v438_v7, 0.0 }
 0x1d0   :  { %v444_v13 = vadd.f32 %v443_v12, %v240_v5  ;;  %v477_v16 = vmax.f32 %v440_v9, 0.0 }
 0x1d1   :  { %v478_v15 = vmax.f32 %v442_v11, 0.0 }
 0x1d2   :  { %v479_v17 = vmax.f32 %v444_v13, 0.0 }
 0x1d3   :  { %v492_v18 = vpack.c.bf16 %v478_v15, %v476_v14 }
 0x1d4   :  { %v493_v19 = vpack.c.bf16 %v479_v17, %v477_v16  ;;  %v447_v20 = vpop.f32.mrb[4].mxu1 }
 0x1d5   :  { %v448_v21 = vadd.f32 %v447_v20, %v236_v4  ;;  %v449_v63 = vpop.f32.mrb[5].mxu1 }
 0x1d6   :  { %v450_v22 = vadd.f32 %v449_v63, %v240_v5  ;;  %v451_v62 = vpop.f32.mrb[6].mxu1  ;;  %667 = vmatprep.mubr.bf16.mxu0 %v493_v19 }
 0x1d7   :  { %v452_v1 = vadd.f32 %v451_v62, %v236_v4  ;;  %v453_v23 = vpop.f32.mrb[7].mxu1  ;;  %668 = vmatmul.mubr.bf16.vlgmr.msra.gmra.mrb[16].mxu0 %v492_v18  ;;  %v480_v25 = vmax.f32 %v448_v21, 0.0 }
 0x1d8   :  { %v454_v24 = vadd.f32 %v453_v23, %v240_v5  ;;  %v481_v27 = vmax.f32 %v450_v22, 0.0 }
 0x1d9   :  { %v482_v26 = vmax.f32 %v452_v1, 0.0 }
 0x1da   :  { %v483_v28 = vmax.f32 %v454_v24, 0.0 }
 0x1db   :  { %v494_v29 = vpack.c.bf16 %v482_v26, %v480_v25 }
 0x1dc   :  { %v495_v30 = vpack.c.bf16 %v483_v28, %v481_v27  ;;  %v457_v31 = vpop.f32.mrb[8].mxu1 }
 0x1dd   :  { %v458_v32 = vadd.f32 %v457_v31, %v236_v4  ;;  %v459_v33 = vpop.f32.mrb[9].mxu1 }
 0x1de   :  { %v460_v34 = vadd.f32 %v459_v33, %v240_v5  ;;  %v461_v35 = vpop.f32.mrb[10].mxu1  ;;  %675 = vmatprep.mubr.bf16.mxu0 %v495_v30 }
 0x1df   :  { %v462_v36 = vadd.f32 %v461_v35, %v236_v4  ;;  %v463_v37 = vpop.f32.mrb[11].mxu1  ;;  %676 = vmatmul.mubr.bf16.gmra.mrb[20].mxu0 %v494_v29  ;;  %v484_v39 = vmax.f32 %v458_v32, 0.0 }
 0x1e0   :  { %v464_v38 = vadd.f32 %v463_v37, %v240_v5  ;;  %v485_v41 = vmax.f32 %v460_v34, 0.0 }
 0x1e1   :  { %v486_v40 = vmax.f32 %v462_v36, 0.0 }
 0x1e2   :  { %v487_v42 = vmax.f32 %v464_v38, 0.0 }
 0x1e3   :  { %v496_v43 = vpack.c.bf16 %v486_v40, %v484_v39 }
 0x1e4   :  { %v497_v44 = vpack.c.bf16 %v487_v42, %v485_v41  ;;  %v467_v45 = vpop.f32.mrb[12].mxu1 }
 0x1e5   :  { %v468_v46 = vadd.f32 %v467_v45, %v236_v4  ;;  %v469_v47 = vpop.f32.mrb[13].mxu1 }
 0x1e6   :  { %v470_v48 = vadd.f32 %v469_v47, %v240_v5  ;;  %v471_v49 = vpop.f32.mrb[14].mxu1  ;;  %683 = vmatprep.mubr.bf16.mxu0 %v497_v44 }
 0x1e7   :  { %v472_v50 = vadd.f32 %v471_v49, %v236_v4  ;;  %v473_v51 = vpop.f32.mrb[15].mxu1  ;;  %684 = vmatmul.mubr.bf16.gmra.mrb[24].mxu0 %v496_v43  ;;  %v488_v53 = vmax.f32 %v468_v46, 0.0 }
 0x1e8   :  { %v474_v52 = vadd.f32 %v473_v51, %v240_v5  ;;  %v489_v55 = vmax.f32 %v470_v48, 0.0 }
 0x1e9   :  { %v490_v54 = vmax.f32 %v472_v50, 0.0 }
 0x1ea   :  { %v491_v56 = vmax.f32 %v474_v52, 0.0 }
 0x1eb   :  { %v498_v57 = vpack.c.bf16 %v490_v54, %v488_v53 }
 0x1ec   :  { %v499_v58 = vpack.c.bf16 %v491_v56, %v489_v55 }
 0x1ee   :  { %691 = vmatprep.mubr.bf16.mxu0 %v499_v58 }
 0x1ef   :  { %692 = vmatmul.mubr.bf16.gmra.mrb[28].mxu0 %v498_v57 }
 0x2aa   :  { %v787_v59 = vpop.f32.mrb[16].mxu0 }
 0x2ab   :  { %v788_v61 = vpop.f32.mrb[17].mxu0 }
 0x2ac   :  { %v789_v0 = vadd.f32 %v788_v61, %v787_v59  ;;  %v790_v2 = vpop.f32.mrb[18].mxu0 }
 0x2ad   :  { %v791_v3 = vpop.f32.mrb[19].mxu0 }
 0x2ae   :  { %v670_v4 = vadd.f32 %v789_v0, %v754_v60  ;;  %v792_v5 = vadd.f32 %v791_v3, %v790_v2 }
 0x2b0   :  { %701 = vst.msk [vmem:[%s1113_s7] sm:$0xff] %vm700_vm1, %v670_v4  ;;  %v673_v6 = vadd.f32 %v792_v5, %v754_v60 }
 0x2b2   :  { %702 = vst.msk [vmem:[%s1113_s7 + $0x8] sm:$0xff] %vm700_vm1, %v673_v6  ;;  %v793_v7 = vpop.f32.mrb[20].mxu0 }
 0x2b3   :  { %v794_v8 = vpop.f32.mrb[21].mxu0 }
 0x2b4   :  { %v795_v9 = vadd.f32 %v794_v8, %v793_v7  ;;  %v796_v10 = vpop.f32.mrb[22].mxu0 }
 0x2b5   :  { %v797_v11 = vpop.f32.mrb[23].mxu0 }
 0x2b6   :  { %v678_v12 = vadd.f32 %v795_v9, %v754_v60  ;;  %v798_v13 = vadd.f32 %v797_v11, %v796_v10 }
 0x2b8   :  { %703 = vst.msk [vmem:[%s1113_s7 + $0x10] sm:$0xff] %vm700_vm1, %v678_v12  ;;  %v681_v14 = vadd.f32 %v798_v13, %v754_v60 }
 0x2ba   :  { %704 = vst.msk [vmem:[%s1113_s7 + $0x18] sm:$0xff] %vm700_vm1, %v681_v14  ;;  %v799_v15 = vpop.f32.mrb[24].mxu0 }
 0x2bb   :  { %v800_v16 = vpop.f32.mrb[25].mxu0 }
 0x2bc   :  { %v801_v17 = vadd.f32 %v800_v16, %v799_v15  ;;  %v802_v18 = vpop.f32.mrb[26].mxu0 }
 0x2bd   :  { %v803_v19 = vpop.f32.mrb[27].mxu0 }
 0x2be   :  { %v686_v20 = vadd.f32 %v801_v17, %v754_v60  ;;  %v804_v21 = vadd.f32 %v803_v19, %v802_v18 }
 0x2c0   :  { %705 = vst.msk [vmem:[%s1113_s7 + $0x20] sm:$0xff] %vm700_vm1, %v686_v20  ;;  %v689_v63 = vadd.f32 %v804_v21, %v754_v60 }
 0x2c2   :  { %706 = vst.msk [vmem:[%s1113_s7 + $0x28] sm:$0xff] %vm700_vm1, %v689_v63  ;;  %v805_v22 = vpop.f32.mrb[28].mxu0 }
 0x2c3   :  { %v806_v62 = vpop.f32.mrb[29].mxu0 }
 0x2c4   :  { %v807_v1 = vadd.f32 %v806_v62, %v805_v22  ;;  %v808_v23 = vpop.f32.mrb[30].mxu0 }
 0x2c5   :  { %v809_v24 = vpop.f32.mrb[31].mxu0 }
 0x2c6   :  { %v694_v25 = vadd.f32 %v807_v1, %v754_v60  ;;  %v810_v26 = vadd.f32 %v809_v24, %v808_v23 }
 0x2c8   :  { %707 = vst.msk [vmem:[%s1113_s7 + $0x30] sm:$0xff] %vm700_vm1, %v694_v25  ;;  %v697_v27 = vadd.f32 %v810_v26, %v754_v60 }
 0x2ca   :  { %708 = vst.msk [vmem:[%s1113_s7 + $0x38] sm:$0xff] %vm700_vm1, %v697_v27 }
 0x2cb   :  { %713 = vsyncpa [#allocation3], 1 }

</bundles_post_ra>
